<compile_context>
chip_gen: v7x
topology: tpu7x:2x2x1
jax: 0.10.0
libtpu: 0.0.40
codegen_flags: <defaults>
</compile_context>

<pallas_src>
import functools

import jax
import jax.numpy as jnp
import numpy as np
from jax.experimental import pallas as pl
from jax.experimental.pallas import tpu as pltpu


def _round_up(n: int, m: int) -> int:
    return ((n + m - 1) // m) * m


def _build_moving_avg_matrix(seq_len: int, kernel_size: int) -> np.ndarray:
    """A[t, s] such that (A @ x) == moving_avg(x) with edge-replication padding."""
    pad = (kernel_size - 1) // 2
    A = np.zeros((seq_len, seq_len), dtype=np.float64)
    for t in range(seq_len):
        for j in range(kernel_size):
            src = min(max(t + j - pad, 0), seq_len - 1)
            A[t, src] += 1.0 / kernel_size
    return A.astype(np.float32)


def _dlinear_gemm_kernel(x_ref, m_ref, b_ref, o_ref):
    # One MXU matmul per batch tile: (TB, K) @ (K, Npad), f32 accumulation,
    # bias broadcast-added on the VPU, lane-dense (multiple-of-128) store.
    acc = jnp.dot(x_ref[...], m_ref[...], preferred_element_type=jnp.float32)
    o_ref[...] = (acc + b_ref[...]).astype(o_ref.dtype)


@functools.partial(jax.jit, static_argnames=("kernel_size", "block_b"))
def dlinear_forward(x, Ws, bs, Wt, bt, Wa, ba, kernel_size=7, block_b=256):
    """x: (B, L, C) -> (B, P, O), matching DLinear.forward (individual=False)."""
    B, L, C = x.shape
    P = Ws.shape[0]
    O = Wa.shape[0]
    K = L * C
    N = P * O

    # ---- algebraic folding (exact; plain-JAX glue, traced once under jit) ----
    A = jnp.asarray(_build_moving_avg_matrix(L, kernel_size))                  # (L, L)
    W_eff = Ws + jnp.dot(Wt - Ws, A, precision=jax.lax.Precision.HIGHEST)      # (P, L)
    # M[l*C + c, p*O + o] = W_eff[p, l] * Wa[o, c]   (pure outer product)
    M = jnp.einsum('pl,oc->lcpo', W_eff, Wa).reshape(K, N)                     # (K, N)
    b_eff = ((bs + bt)[:, None] * jnp.sum(Wa, axis=1)[None, :]
             + ba[None, :]).reshape(1, N)                                      # (1, N)

    # ---- pad to lane/sublane friendly shapes ----
    Npad = _round_up(N, 128)                 # lane-dense output slab -> unmasked stores
    tb = min(block_b, _round_up(B, 8))       # batch tile, multiple of 8 sublanes
    Bpad = _round_up(B, tb)

    x_flat = jnp.pad(x.reshape(B, K), ((0, Bpad - B), (0, 0)))
    M_pad = jnp.pad(M.astype(x.dtype), ((0, 0), (0, Npad - N)))
    b_pad = jnp.pad(b_eff.astype(jnp.float32), ((0, 0), (0, Npad - N)))

    out = pl.pallas_call(
        _dlinear_gemm_kernel,
        out_shape=jax.ShapeDtypeStruct((Bpad, Npad), x.dtype),
        grid_spec=pltpu.PrefetchScalarGridSpec(
            num_scalar_prefetch=0,
            grid=(Bpad // tb,),
            in_specs=[
                pl.BlockSpec((tb, K), lambda i: (i, 0)),     # batch tile of x
                pl.BlockSpec((K, Npad), lambda i: (0, 0)),   # fused weight (constant block, stays resident)
                pl.BlockSpec((1, Npad), lambda i: (0, 0)),   # fused bias   (constant block)
            ],
            out_specs=pl.BlockSpec((tb, Npad), lambda i: (i, 0)),
        ),
        compiler_params=pltpu.CompilerParams(
            dimension_semantics=("parallel",),
        ),
    )(x_flat, M_pad, b_pad)

    return out[:B, :N].reshape(B, P, O)


def dlinear_reference(x, Ws, bs, Wt, bt, Wa, ba, kernel_size=7):
    """Pure-JAX mirror of the PyTorch forward (for correctness checking)."""
    hi = jax.lax.Precision.HIGHEST
    pad = (kernel_size - 1) // 2
    front = jnp.repeat(x[:, :1, :], pad, axis=1)
    end = jnp.repeat(x[:, -1:, :], pad, axis=1)
    xp = jnp.concatenate([front, x, end], axis=1)
    L = x.shape[1]
    trend = jnp.stack([xp[:, t:t + kernel_size, :].mean(axis=1) for t in range(L)], axis=1)
    res = x - trend
    seasonal_out = jnp.einsum('blc,pl->bcp', res, Ws, precision=hi) + bs        # (B, C, P)
    trend_out = jnp.einsum('blc,pl->bcp', trend, Wt, precision=hi) + bt         # (B, C, P)
    s = seasonal_out + trend_out                                                # (B, C, P)
    out = jnp.einsum('bcp,oc->bpo', s, Wa, precision=hi) + ba                   # (B, P, O)
    return out


if __name__ == "__main__":
    # DLinear(seq_len=16, pred_len=8, enc_in=4, enc_out=3, individual=False)
    B, L, C, P, O = 2, 16, 4, 8, 3
    kernel_size = 7

    key = jax.random.PRNGKey(0)
    kx, k1, k2, k3, k4, k5, k6 = jax.random.split(key, 7)

    x = jax.random.normal(kx, (B, L, C), dtype=jnp.float32)

    # deterministic synthetic parameters (shapes match the PyTorch module)
    Ws = jax.random.normal(k1, (P, L), dtype=jnp.float32) * 0.1   # Linear_Seasonal.weight
    bs = jax.random.normal(k2, (P,), dtype=jnp.float32) * 0.1     # Linear_Seasonal.bias
    Wt = jax.random.normal(k3, (P, L), dtype=jnp.float32) * 0.1   # Linear_Trend.weight
    bt = jax.random.normal(k4, (P,), dtype=jnp.float32) * 0.1     # Linear_Trend.bias
    Wa = jax.random.normal(k5, (O, C), dtype=jnp.float32) * 0.1   # adjust_channels.weight
    ba = jax.random.normal(k6, (O,), dtype=jnp.float32) * 0.1     # adjust_channels.bias

    out = dlinear_forward(x, Ws, bs, Wt, bt, Wa, ba, kernel_size=kernel_size)
    out = jax.block_until_ready(out)

    ref = dlinear_reference(x, Ws, bs, Wt, bt, Wa, ba, kernel_size=kernel_size)
    np.testing.assert_allclose(np.asarray(out), np.asarray(ref), rtol=5e-5, atol=5e-5)

    # TODO(synk): the individual=True per-channel variant is not implemented (module default is False).
    print("KERNEL_OK")
</pallas_src>

<mosaic_0001>
module attributes {stable_mosaic.version = 11 : i64} {
  func.func @_dlinear_gemm_kernel(%arg0: i32, %arg1: memref<8x64xf32, #tpu.memory_space<vmem>>, %arg2: memref<64x128xf32, #tpu.memory_space<vmem>>, %arg3: memref<1x128xf32, #tpu.memory_space<vmem>>, %arg4: memref<8x128xf32, #tpu.memory_space<vmem>>) attributes {dimension_semantics = [#tpu.dimension_semantics<parallel>], iteration_bounds = array<i64: 1>, scalar_prefetch = 0 : i64, scratch_operands = 0 : i64, tpu.core_type = #tpu.core_type<tc>, window_params = [{transform_indices = @transform_0, window_bounds = array<i64: 8, 64>}, {pipeline_mode = #tpu.pipeline_mode<synchronous>, transform_indices = @transform_1, window_bounds = array<i64: 64, 128>}, {pipeline_mode = #tpu.pipeline_mode<synchronous>, transform_indices = @transform_2, window_bounds = array<i64: 1, 128>}, {transform_indices = @transform_3, window_bounds = array<i64: 8, 128>}]} {
    %c0 = arith.constant 0 : index
    %c0_0 = arith.constant 0 : index
    %0 = vector.load %arg1[%c0, %c0_0] : memref<8x64xf32, #tpu.memory_space<vmem>>, vector<8x64xf32>
    %c0_1 = arith.constant 0 : index
    %c0_2 = arith.constant 0 : index
    %1 = vector.load %arg2[%c0_1, %c0_2] : memref<64x128xf32, #tpu.memory_space<vmem>>, vector<64x128xf32>
    %cst = arith.constant dense<0.000000e+00> : vector<8x128xf32>
    %2 = tpu.matmul %0, %1, %cst {dimension_numbers = #tpu.dot_dimension_numbers<[1], [0], [0], [1], [0, 0, 1, 1], [], []>} : vector<8x64xf32>, vector<64x128xf32>, vector<8x128xf32> -> vector<8x128xf32>
    %c0_3 = arith.constant 0 : index
    %c0_4 = arith.constant 0 : index
    %3 = vector.load %arg3[%c0_3, %c0_4] : memref<1x128xf32, #tpu.memory_space<vmem>>, vector<1x128xf32>
    %4 = vector.broadcast %3 : vector<1x128xf32> to vector<8x128xf32>
    %5 = arith.addf %2, %4 : vector<8x128xf32>
    %c0_5 = arith.constant 0 : index
    %c0_6 = arith.constant 0 : index
    %6 = vector.load %arg4[%c0_5, %c0_6] : memref<8x128xf32, #tpu.memory_space<vmem>>, vector<8x128xf32>
    tpu.vector_store %arg4[%c0_5, %c0_6], %5 {strides = array<i32>} : memref<8x128xf32, #tpu.memory_space<vmem>>, vector<8x128xf32>,
    return
  }
  func.func @transform_0(%arg0: i32) -> (i32, i32) {
    %c0_i32 = arith.constant 0 : i32
    %c0_i32_0 = arith.constant 0 : i32
    return %arg0, %c0_i32 : i32, i32
  }
  func.func @transform_1(%arg0: i32) -> (i32, i32) {
    %c0_i32 = arith.constant 0 : i32
    %c0_i32_0 = arith.constant 0 : i32
    %c0_i32_1 = arith.constant 0 : i32
    return %c0_i32, %c0_i32_0 : i32, i32
  }
  func.func @transform_2(%arg0: i32) -> (i32, i32) {
    %c0_i32 = arith.constant 0 : i32
    %c0_i32_0 = arith.constant 0 : i32
    %c0_i32_1 = arith.constant 0 : i32
    return %c0_i32, %c0_i32_0 : i32, i32
  }
  func.func @transform_3(%arg0: i32) -> (i32, i32) {
    %c0_i32 = arith.constant 0 : i32
    %c0_i32_0 = arith.constant 0 : i32
    return %arg0, %c0_i32 : i32, i32
  }
}

</mosaic_0001>

<bundles_post_ra>
// kernel: dlinear_forward.1
= control target key start
LH: loop header
LB: loop body
LE: loop exit
PB: predicated region body
PF: predicated region fallthrough
CT: control target
= control target key end

     0   :  { %v154_v0 = vmov 0.0|0.0   ;;  %vm155_vm0 = vmmov 0   ;;  %v156_v4 = vmov 0.0   ;;  %vm30_vm1 = vcmask 523264   ;;  %s210_s1 = inlined_call_operand.vmem [shape: f32[64,128], index: 1, kind: input, shape index: {}]   ;;  %s211_s0 = inlined_call_operand.vmem [shape: f32[8,64], index: 0, kind: input, shape index: {}]   ;;  %s212_s2 = inlined_call_operand.vmem [shape: f32[1,128], index: 2, kind: input, shape index: {}]   ;;  %s213_s3 = inlined_call_operand.vmem [shape: f32[8,128], index: 3, kind: output, shape index: {}]  }
   0x1   :  { %139 = vmatprep.subr.bf16.mxu0 %v154_v0  ;;  %v15_v1 = vld [vmem:[%s210_s1] sm:$0xff]  ;;  %v16_v2 = vld [vmem:[%s210_s1 + $0x8] sm:$0xff]  ;;  %v17_v3 = vld [vmem:[%s210_s1 + $0x10] sm:$0xff]  ;;  %136 = vmatprep.mubr.msk.f32.mxu0 %vm155_vm0, %v156_v4 }
   0x2   :  { %v140_v5 = vpack.c.bf16 %v16_v2, %v15_v1  ;;  %v18_v6 = vld [vmem:[%s210_s1 + $0x18] sm:$0xff]  ;;  %v19_v8 = vld [vmem:[%s210_s1 + $0x20] sm:$0xff]  ;;  %v20_v9 = vld [vmem:[%s210_s1 + $0x28] sm:$0xff] }
   0x3   :  { %v143_v7 = vpack.c.bf16 %v18_v6, %v17_v3  ;;  %v146_v10 = vpack.c.bf16 %v20_v9, %v19_v8  ;;  %v21_v11 = vld [vmem:[%s210_s1 + $0x30] sm:$0xff]  ;;  %v22_v12 = vld [vmem:[%s210_s1 + $0x38] sm:$0xff]  ;;  %v14_v14 = vld [vmem:[%s211_s0] sm:$0xff] }
   0x4   :  { %141 = vmatpush3.bf16.msra.mxu0 %v140_v5  ;;  %v149_v13 = vpack.c.bf16 %v22_v12, %v21_v11  ;;  %v109_v15 = vld [vmem:[%s212_s2] ss:$0 sm:$0xff] }
   0x5   :  { %142 = vmatprep.subr.bf16.mxu0 %v154_v0 }
   0x8   :  { %144 = vmatpush3.bf16.msra.mxu0 %v143_v7 }
   0x9   :  { %145 = vmatprep.subr.bf16.mxu0 %v154_v0 }
   0xc   :  { %147 = vmatpush3.bf16.msra.mxu0 %v146_v10 }
   0xd   :  { %148 = vmatprep.subr.bf16.mxu0 %v154_v0 }
  0x10   :  { %150 = vmatpush3.bf16.msra.mxu0 %v149_v13 }
  0x13   :  { %137 = vmatmul.mubr.msk.f32.vlgmr.msra.gmra.mrb[0].mxu0 %vm30_vm1, %v14_v14 }
  0xe6   :  { %v100_v16 = vpop.f32.mrb[0].mxu0 }
  0xe7   :  { %v101_v17 = vadd.f32 %v109_v15, %v100_v16  ;;  %v138_v18 = vpop.f32.mrb[1].mxu0 }
  0xe9   :  { %104 = vst [vmem:[%s213_s3] sm:$0xff] %v101_v17 }

</bundles_post_ra>
